<compile_context>
chip_gen: v5e
topology: v5e:2x2
jax: 0.10.0
libtpu: 0.0.40
codegen_flags: <defaults>
</compile_context>

<pallas_src>
import jax
import jax.numpy as jnp
from jax import lax
from jax.experimental import pallas as pl
from jax.experimental.pallas import tpu as pltpu


# ----------------------------------------------------------------------------
# Kernel body: one MXU dot + one store.  Everything else lives in the wrapper.
#   w_ref: VMEM (Cout, R+1)        weights with bias folded as the last column
#   p_ref: VMEM (R+1, N*OH*OW)     im2col patches with a trailing ones row
#   o_ref: VMEM (Cout, N*OH*OW)
# ----------------------------------------------------------------------------
def _conv_matmul_kernel(w_ref, p_ref, o_ref):
    o_ref[...] = jnp.dot(
        w_ref[...], p_ref[...], preferred_element_type=jnp.float32
    ).astype(o_ref.dtype)


def conv2d_pallas(x, w, b):
    """Valid-padding, stride-1 Conv2d as wrapper-side im2col + single-dot kernel."""
    N, Cin, H, W = x.shape
    Cout, _, KH, KW = w.shape
    OH, OW = H - KH + 1, W - KW + 1
    S = OH * OW
    R = KH * KW * Cin

    # ---- wrapper-side layout plumbing (pure JAX, outside the kernel) --------
    # Weight columns in tap-major order: col = (i*KW + j)*Cin + c.
    w2 = jnp.transpose(w, (0, 2, 3, 1)).reshape(Cout, R)
    # Fold bias into the contraction (bias column <-> ones row).
    w_aug = jnp.concatenate([w2, b.reshape(Cout, 1)], axis=1)          # (Cout, R+1)

    # im2col with matching row order; all images collapsed into the lane dim.
    taps = [x[:, :, i:i + OH, j:j + OW] for i in range(KH) for j in range(KW)]
    patches = jnp.stack(taps, axis=1)                  # (N, KH*KW, Cin, OH, OW)
    patches = patches.reshape(N, R, S)                 # rows: tap-major then c
    patches = jnp.transpose(patches, (1, 0, 2)).reshape(R, N * S)
    patches_aug = jnp.concatenate(
        [patches, jnp.ones((1, N * S), dtype=patches.dtype)], axis=0)  # (R+1, N*S)

    out = pl.pallas_call(
        _conv_matmul_kernel,
        out_shape=jax.ShapeDtypeStruct((Cout, N * S), x.dtype),
        in_specs=[
            pl.BlockSpec(memory_space=pltpu.MemorySpace.VMEM),
            pl.BlockSpec(memory_space=pltpu.MemorySpace.VMEM),
        ],
        out_specs=pl.BlockSpec(memory_space=pltpu.MemorySpace.VMEM),
    )(w_aug, patches_aug)

    # (Cout, N*S) -> (N, Cout, OH, OW): wrapper-side layout plumbing.
    return jnp.transpose(out.reshape(Cout, N, OH, OW), (1, 0, 2, 3))


# ----------------------------------------------------------------------------
# Model forward: s = conv1(x1) is the returned value.  conv2 / bn / cat / relu
# do not affect `s` (dead code) and are not executed.
# ----------------------------------------------------------------------------
@jax.jit
def model_forward(x1, params):
    return conv2d_pallas(x1, params["w1"], params["b1"])


def init_params(key):
    # Mimic PyTorch Conv2d default init: U(-k, k), k = 1/sqrt(fan_in).
    k1, k2, k3, k4 = jax.random.split(key, 4)
    fan_in = 3 * 3 * 3
    bound = 1.0 / jnp.sqrt(fan_in)
    params = {
        "w1": jax.random.uniform(k1, (3, 3, 3, 3), jnp.float32, -bound, bound),
        "b1": jax.random.uniform(k2, (3,), jnp.float32, -bound, bound),
        # Parameters of the dead branch kept for module fidelity (unused).
        "w2": jax.random.uniform(k3, (3, 3, 3, 3), jnp.float32, -bound, bound),
        "b2": jax.random.uniform(k4, (3,), jnp.float32, -bound, bound),
        "gamma": jnp.ones((3,), jnp.float32),
        "beta": jnp.zeros((3,), jnp.float32),
    }
    return params


if __name__ == "__main__":
    key = jax.random.PRNGKey(0)
    kx, kp = jax.random.split(key)
    # Matches the module's example input x1 = torch.randn(1, 3, 6, 6)
    x1 = jax.random.normal(kx, (1, 3, 6, 6), jnp.float32)
    params = init_params(kp)

    s = model_forward(x1, params)
    jax.block_until_ready(s)

    # Sanity check against a pure-JAX conv reference.
    s_ref = lax.conv_general_dilated(
        x1, params["w1"], window_strides=(1, 1), padding="VALID",
        dimension_numbers=("NCHW", "OIHW", "NCHW"),
    ) + params["b1"][None, :, None, None]
    assert s.shape == (1, 3, 4, 4)
    assert jnp.allclose(s, s_ref, atol=1e-5), "mismatch vs reference conv"

    print("KERNEL_OK")
</pallas_src>

<mosaic_0001>
module attributes {stable_mosaic.version = 11 : i64} {
  func.func @_conv_matmul_kernel(%arg0: memref<3x28xf32, #tpu.memory_space<vmem>>, %arg1: memref<28x16xf32, #tpu.memory_space<vmem>>, %arg2: memref<3x16xf32, #tpu.memory_space<vmem>>) attributes {dimension_semantics = [], scalar_prefetch = 0 : i64, scratch_operands = 0 : i64, tpu.core_type = #tpu.core_type<tc>} {
    %c0 = arith.constant 0 : index
    %c0_0 = arith.constant 0 : index
    %0 = vector.load %arg0[%c0, %c0_0] : memref<3x28xf32, #tpu.memory_space<vmem>>, vector<3x28xf32>
    %c0_1 = arith.constant 0 : index
    %c0_2 = arith.constant 0 : index
    %1 = vector.load %arg1[%c0_1, %c0_2] : memref<28x16xf32, #tpu.memory_space<vmem>>, vector<28x16xf32>
    %cst = arith.constant dense<0.000000e+00> : vector<3x16xf32>
    %2 = tpu.matmul %0, %1, %cst {dimension_numbers = #tpu.dot_dimension_numbers<[1], [0], [0], [1], [0, 0, 1, 1], [], []>} : vector<3x28xf32>, vector<28x16xf32>, vector<3x16xf32> -> vector<3x16xf32>
    %c0_3 = arith.constant 0 : index
    %c0_4 = arith.constant 0 : index
    %3 = vector.load %arg2[%c0_3, %c0_4] : memref<3x16xf32, #tpu.memory_space<vmem>>, vector<3x16xf32>
    tpu.vector_store %arg2[%c0_3, %c0_4], %2 {strides = array<i32>} : memref<3x16xf32, #tpu.memory_space<vmem>>, vector<3x16xf32>,
    return
  }
}

</mosaic_0001>

<bundles_post_ra>
// kernel: model_forward.1
= control target key start
LH: loop header
LB: loop body
LE: loop exit
PB: predicated region body
PF: predicated region fallthrough
CT: control target
= control target key end

     0   :  { %vm20_vm0 = vcmask 1043456   ;;  %vm16_vm1 = vcmask 228352   ;;  %vm44_vm2 = vcmask 124928   ;;  %s85_s1 = inlined_call_operand.vmem [shape: f32[28,16], index: 1, kind: input, shape index: {}]   ;;  %s86_s0 = inlined_call_operand.vmem [shape: f32[3,28], index: 0, kind: input, shape index: {}]   ;;  %s87_s2 = inlined_call_operand.vmem [shape: f32[3,16], index: 2, kind: output, shape index: {}]  }
   0x1   :  { %v15_v0 = vld [vmem:[%s85_s1 + $0x18] sm:$0xf]  ;;  %v14_v1 = vld [vmem:[%s85_s1 + $0x10] sm:$0xff]  ;;  %v13_v2 = vld [vmem:[%s85_s1 + $0x8] sm:$0xff] }
   0x2   :  { %50 = vmatpush.msk.msra.mxu0 %vm20_vm0, %v15_v0  ;;  %v12_v3 = vld [vmem:[%s85_s1] sm:$0xff] }
   0x3   :  { %v11_v4 = vld [vmem:[%s86_s0] sm:$0x7] }
   0x4   :  { %37 = vmatpush.msra.mxu0 %v14_v1 }
   0x6   :  { %38 = vmatpush.msra.mxu0 %v13_v2 }
   0x8   :  { %39 = vmatpush.msra.mxu0 %v12_v3 }
   0x9   :  { %51 = vmatmul.msk.f32.vlgmr.msra.gmra.mxu0 %vm16_vm1, %v11_v4 }
  0x86   :  { %v41_v5 = vpop.f32.mrf.mxu0 }
  0x87   :  { %45 = vst.msk [vmem:[%s87_s2] sm:$0x7] %vm44_vm2, %v41_v5 }

</bundles_post_ra>
